<compile_context>
chip_gen: v7x
topology: tpu7x:2x2x1
jax: 0.10.0
libtpu: 0.0.40
codegen_flags: <defaults>
</compile_context>

<pallas_src>
import jax
import jax.numpy as jnp
import numpy as np
from jax.experimental import pallas as pl
from jax.experimental.pallas import tpu as pltpu


# --------------------------------------------------------------------------
# Kernels
# --------------------------------------------------------------------------
def conv_stats_kernel(w_ref, p_ref, conv_ref, s1_ref, s2_ref):
    """Pass 1: per-M-tile conv matmul (one fused K = KH*KW*Cin MXU push),
    accumulating per-channel sum / sum-of-squares into resident (Cout, 1)
    outputs across the 'arbitrary' M grid axis."""
    @pl.when(pl.program_id(0) == 0)
    def _():
        s1_ref[...] = jnp.zeros_like(s1_ref)
        s2_ref[...] = jnp.zeros_like(s2_ref)

    # bf16 x bf16 -> f32 accumulation on the MXU; lane-dense (Cout, tM) tile.
    acc = jnp.dot(w_ref[...], p_ref[...], preferred_element_type=jnp.float32)
    conv_ref[...] = acc

    # One-pass statistics (lane-axis reductions); accumulated across M tiles.
    # TODO(synk): a shifted / Welford-style cross-tile accumulation avoids
    # cancellation when |mean| >> std; fine for normalized activations.
    s1_ref[...] += jnp.sum(acc, axis=1, keepdims=True)
    s2_ref[...] += jnp.sum(acc * acc, axis=1, keepdims=True)
    # TODO(synk): on v7x, split this stats pass across the two TensorCores
    # with a CMEM combine instead of a single 'arbitrary' chain.


def bn_relu_kernel(ss_ref, conv_ref, o_ref):
    """Pass 2: folded BN affine (scale/shift packed as one (Cout, 2) operand)
    + ReLU on each lane-dense (Cout, tM) conv tile."""
    scale = ss_ref[:, 0:1]
    shift = ss_ref[:, 1:2]
    o_ref[...] = jnp.maximum(conv_ref[...] * scale + shift, 0.0).astype(o_ref.dtype)


# --------------------------------------------------------------------------
# Wrapper
# --------------------------------------------------------------------------
def _pick_m_tile(m_total, k, cout, budget_bytes=8 << 20):
    """Largest multiple-of-128 divisor of M whose double-buffered patch +
    conv-tile footprint fits a conservative VMEM budget (safe under the
    v5e 16 MiB scoped default and v7x's 64 MiB physical VMEM).  Falls back
    to a single full-M block for tiny M."""
    best = None
    for t in range(128, m_total + 1, 128):
        if m_total % t:
            continue
        footprint = 2 * t * (k * 2 + 2 * cout * 4)  # bf16 patches + f32 conv in/out
        if footprint <= budget_bytes:
            best = t
    return best if best is not None else m_total


def _conv_block_forward(x_nchw, w_oihw, bias, gamma, beta, *,
                        stride=1, padding=1, eps=1e-5, m_tile=None,
                        output_layout="NCHW"):
    """PyTorch-equivalent ConvBlock forward. x: NCHW, w: OIHW."""
    del bias  # Exactly cancelled by training-mode BN mean subtraction.
    N, Cin, H, W = x_nchw.shape
    Cout, _, KH, KW = w_oihw.shape
    OH = (H + 2 * padding - KH) // stride + 1
    OW = (W + 2 * padding - KW) // stride + 1
    M = N * OH * OW
    K = KH * KW * Cin

    if m_tile is None:
        m_tile = _pick_m_tile(M, K, Cout)
    assert M % m_tile == 0 and (m_tile == M or m_tile % 128 == 0)
    num_m = M // m_tile

    # ---- layout glue (zero FLOPs; fused under jit) ------------------------
    x = x_nchw.astype(jnp.bfloat16)
    x_pad = jnp.pad(x, ((0, 0), (0, 0),
                        (padding, padding), (padding, padding)))
    # im2col:  K order = (kh, kw, cin),  M order = (n, oh, ow).
    taps = []
    for kh in range(KH):
        for kw in range(KW):
            taps.append(x_pad[:, :,
                              kh:kh + (OH - 1) * stride + 1:stride,
                              kw:kw + (OW - 1) * stride + 1:stride])
    patches = jnp.stack(taps, axis=0)                     # (KH*KW, N, Cin, OH, OW)
    patches = jnp.transpose(patches, (0, 2, 1, 3, 4)).reshape(K, M)
    w_flat = jnp.transpose(w_oihw, (0, 2, 3, 1)).reshape(Cout, K).astype(jnp.bfloat16)
    # TODO(synk): in-kernel per-tap (Cout,Cin)@(Cin,tM) accumulation straight
    # from x_pad would remove the KH*KW input read amplification entirely, but
    # needs a relayout-free in-VMEM patch layout; left as a follow-up.

    # ---- pass 1: conv matmul per M tile + per-channel sum / sumsq ---------
    conv_cm, s1, s2 = pl.pallas_call(
        conv_stats_kernel,
        out_shape=(jax.ShapeDtypeStruct((Cout, M), jnp.float32),
                   jax.ShapeDtypeStruct((Cout, 1), jnp.float32),
                   jax.ShapeDtypeStruct((Cout, 1), jnp.float32)),
        grid=(num_m,),
        in_specs=[pl.BlockSpec((Cout, K), lambda m: (0, 0)),      # weights resident
                  pl.BlockSpec((K, m_tile), lambda m: (0, m))],   # pipelined patches
        out_specs=(pl.BlockSpec((Cout, m_tile), lambda m: (0, m)),
                   pl.BlockSpec((Cout, 1), lambda m: (0, 0)),
                   pl.BlockSpec((Cout, 1), lambda m: (0, 0))),
        compiler_params=pltpu.CompilerParams(
            dimension_semantics=("arbitrary",),          # stats carried across M
            allow_input_fusion=[False, True]),           # fuse im2col producers
        cost_estimate=pl.CostEstimate(
            flops=2 * Cout * K * M + 3 * Cout * M,
            transcendentals=0,
            bytes_accessed=2 * (Cout * K + K * M) + 4 * (Cout * M + 2 * Cout)),
    )(w_flat, patches)

    # ---- fold BN affine into one per-channel scale/shift (tiny, fused) ----
    inv_m = jnp.float32(1.0 / M)
    mean = s1 * inv_m
    var = s2 * inv_m - mean * mean                        # biased (training-mode BN)
    g2 = gamma.reshape(Cout, 1).astype(jnp.float32)
    b2 = beta.reshape(Cout, 1).astype(jnp.float32)
    scale = g2 * jax.lax.rsqrt(var + eps)
    shift = b2 - mean * scale
    scale_shift = jnp.concatenate([scale, shift], axis=1)  # packed (Cout, 2)
    # TODO(synk): eval-mode BN (running stats) reuses this folded scale/shift
    # with precomputed statistics, but the conv bias must then be restored.

    # ---- pass 2: normalize + ReLU, embarrassingly parallel over M tiles ---
    out_cm = pl.pallas_call(
        bn_relu_kernel,
        out_shape=jax.ShapeDtypeStruct((Cout, M), jnp.float32),
        grid=(num_m,),
        in_specs=[pl.BlockSpec((Cout, 2), lambda m: (0, 0)),
                  pl.BlockSpec((Cout, m_tile), lambda m: (0, m))],
        out_specs=pl.BlockSpec((Cout, m_tile), lambda m: (0, m)),
        compiler_params=pltpu.CompilerParams(
            dimension_semantics=("parallel",)),           # v7x 2-TC sharding
        cost_estimate=pl.CostEstimate(
            flops=3 * Cout * M, transcendentals=0,
            bytes_accessed=4 * (2 * Cout + 2 * Cout * M)),
    )(scale_shift, conv_cm)

    if output_layout == "CM":
        return out_cm                                     # lane-dense (Cout, N*OH*OW)
    out = out_cm.reshape(Cout, N, OH, OW)
    return jnp.transpose(out, (1, 0, 2, 3))               # NCHW (fused under jit)


conv_block_forward = jax.jit(
    _conv_block_forward,
    static_argnames=("stride", "padding", "eps", "m_tile", "output_layout"))


# --------------------------------------------------------------------------
# Reference + test
# --------------------------------------------------------------------------
def reference_conv_block(x, w, b, gamma, beta, stride, padding, eps=1e-5):
    """Plain-JAX reference matching PyTorch ConvBlock (training-mode BN)."""
    out = jax.lax.conv_general_dilated(
        x, w, window_strides=(stride, stride),
        padding=[(padding, padding), (padding, padding)],
        dimension_numbers=("NCHW", "OIHW", "NCHW"))
    out = out + b.reshape(1, -1, 1, 1)
    mean = jnp.mean(out, axis=(0, 2, 3), keepdims=True)
    var = jnp.mean((out - mean) ** 2, axis=(0, 2, 3), keepdims=True)
    xhat = (out - mean) * jax.lax.rsqrt(var + eps)
    y = xhat * gamma.reshape(1, -1, 1, 1) + beta.reshape(1, -1, 1, 1)
    return jnp.maximum(y, 0.0)


if __name__ == "__main__":
    # Small shapes consistent with the module's forward.
    N, Cin, H, W = 2, 4, 16, 16
    Cout, KH, KW = 8, 3, 3
    stride, padding = 1, 1

    key = jax.random.PRNGKey(0)
    k_x, k_w, k_b, k_g, k_bt = jax.random.split(key, 5)

    x = jax.random.normal(k_x, (N, Cin, H, W), jnp.float32)

    # Deterministic parameter init (Conv2d-style uniform fan-in bound).
    fan_in = Cin * KH * KW
    bound = 1.0 / np.sqrt(fan_in)
    w = jax.random.uniform(k_w, (Cout, Cin, KH, KW), jnp.float32, -bound, bound)
    b = jax.random.uniform(k_b, (Cout,), jnp.float32, -bound, bound)
    gamma = 1.0 + 0.1 * jax.random.normal(k_g, (Cout,), jnp.float32)
    beta = 0.1 * jax.random.normal(k_bt, (Cout,), jnp.float32)

    # m_tile=256 -> two M tiles (M = N*OH*OW = 512), exercising the
    # cross-tile stats accumulation and the tiled normalize pass.
    out = conv_block_forward(x, w, b, gamma, beta,
                             stride=stride, padding=padding, m_tile=256)
    out = jax.block_until_ready(out)

    ref = reference_conv_block(x, w, b, gamma, beta, stride, padding)
    np.testing.assert_allclose(np.asarray(out), np.asarray(ref),
                               rtol=2e-2, atol=2e-2)
    print("KERNEL_OK")
</pallas_src>

<mosaic_0001>
module attributes {stable_mosaic.version = 11 : i64} {
  func.func @bn_relu_kernel(%arg0: i32, %arg1: memref<8x2xf32, #tpu.memory_space<vmem>>, %arg2: memref<8x256xf32, #tpu.memory_space<vmem>>, %arg3: memref<8x256xf32, #tpu.memory_space<vmem>>) attributes {dimension_semantics = [#tpu.dimension_semantics<parallel>], iteration_bounds = array<i64: 2>, scalar_prefetch = 0 : i64, scratch_operands = 0 : i64, tpu.core_type = #tpu.core_type<tc>, window_params = [{pipeline_mode = #tpu.pipeline_mode<synchronous>, transform_indices = @transform_0, window_bounds = array<i64: 8, 2>}, {transform_indices = @transform_1, window_bounds = array<i64: 8, 256>}, {transform_indices = @transform_2, window_bounds = array<i64: 8, 256>}]} {
    %c0 = arith.constant 0 : index
    %c0_0 = arith.constant 0 : index
    %0 = vector.load %arg1[%c0, %c0_0] : memref<8x2xf32, #tpu.memory_space<vmem>>, vector<8x1xf32>
    %c0_1 = arith.constant 0 : index
    %c1 = arith.constant 1 : index
    %1 = vector.load %arg1[%c0_1, %c1] : memref<8x2xf32, #tpu.memory_space<vmem>>, vector<8x1xf32>
    %c0_2 = arith.constant 0 : index
    %c0_3 = arith.constant 0 : index
    %2 = vector.load %arg2[%c0_2, %c0_3] : memref<8x256xf32, #tpu.memory_space<vmem>>, vector<8x256xf32>
    %3 = vector.broadcast %0 : vector<8x1xf32> to vector<8x256xf32>
    %4 = arith.mulf %2, %3 : vector<8x256xf32>
    %5 = vector.broadcast %1 : vector<8x1xf32> to vector<8x256xf32>
    %6 = arith.addf %4, %5 : vector<8x256xf32>
    %cst = arith.constant 0.000000e+00 : f32
    %7 = vector.broadcast %cst : f32 to vector<8x256xf32>
    %8 = arith.maximumf %6, %7 : vector<8x256xf32>
    %c0_4 = arith.constant 0 : index
    %c0_5 = arith.constant 0 : index
    %9 = vector.load %arg3[%c0_4, %c0_5] : memref<8x256xf32, #tpu.memory_space<vmem>>, vector<8x256xf32>
    tpu.vector_store %arg3[%c0_4, %c0_5], %8 {strides = array<i32>} : memref<8x256xf32, #tpu.memory_space<vmem>>, vector<8x256xf32>,
    return
  }
  func.func @transform_0(%arg0: i32) -> (i32, i32) {
    %c0_i32 = arith.constant 0 : i32
    %c0_i32_0 = arith.constant 0 : i32
    %c0_i32_1 = arith.constant 0 : i32
    return %c0_i32, %c0_i32_0 : i32, i32
  }
  func.func @transform_1(%arg0: i32) -> (i32, i32) {
    %c0_i32 = arith.constant 0 : i32
    %c0_i32_0 = arith.constant 0 : i32
    return %c0_i32, %arg0 : i32, i32
  }
  func.func @transform_2(%arg0: i32) -> (i32, i32) {
    %c0_i32 = arith.constant 0 : i32
    %c0_i32_0 = arith.constant 0 : i32
    return %c0_i32, %arg0 : i32, i32
  }
}

module attributes {stable_mosaic.version = 11 : i64} {
  func.func @conv_stats_kernel(%arg0: i32, %arg1: memref<8x36xbf16, #tpu.memory_space<vmem>>, %arg2: memref<36x256xbf16, #tpu.memory_space<vmem>>, %arg3: memref<8x256xf32, #tpu.memory_space<vmem>>, %arg4: memref<8x1xf32, #tpu.memory_space<vmem>>, %arg5: memref<8x1xf32, #tpu.memory_space<vmem>>) attributes {dimension_semantics = [#tpu.dimension_semantics<arbitrary>], iteration_bounds = array<i64: 2>, scalar_prefetch = 0 : i64, scratch_operands = 0 : i64, tpu.core_type = #tpu.core_type<tc>, window_params = [{pipeline_mode = #tpu.pipeline_mode<synchronous>, transform_indices = @transform_0, window_bounds = array<i64: 8, 36>}, {transform_indices = @transform_1, window_bounds = array<i64: 36, 256>}, {transform_indices = @transform_2, window_bounds = array<i64: 8, 256>}, {pipeline_mode = #tpu.pipeline_mode<synchronous>, transform_indices = @transform_3, window_bounds = array<i64: 8, 1>}, {pipeline_mode = #tpu.pipeline_mode<synchronous>, transform_indices = @transform_4, window_bounds = array<i64: 8, 1>}]} {
    %c0_i32 = arith.constant 0 : i32
    %0 = arith.cmpi eq, %arg0, %c0_i32 : i32
    %1 = arith.extui %0 : i1 to i32
    %c0_i32_0 = arith.constant 0 : i32
    %2 = arith.cmpi ne, %1, %c0_i32_0 : i32
    scf.if %2 {
      %cst_16 = arith.constant 0.000000e+00 : f32
      %18 = vector.broadcast %cst_16 : f32 to vector<8x1xf32>
      %c0_17 = arith.constant 0 : index
      %c0_18 = arith.constant 0 : index
      %19 = vector.load %arg4[%c0_17, %c0_18] : memref<8x1xf32, #tpu.memory_space<vmem>>, vector<8x1xf32>
      tpu.vector_store %arg4[%c0_17, %c0_18], %18 {strides = array<i32>} : memref<8x1xf32, #tpu.memory_space<vmem>>, vector<8x1xf32>,
      %cst_19 = arith.constant 0.000000e+00 : f32
      %20 = vector.broadcast %cst_19 : f32 to vector<8x1xf32>
      %c0_20 = arith.constant 0 : index
      %c0_21 = arith.constant 0 : index
      %21 = vector.load %arg5[%c0_20, %c0_21] : memref<8x1xf32, #tpu.memory_space<vmem>>, vector<8x1xf32>
      tpu.vector_store %arg5[%c0_20, %c0_21], %20 {strides = array<i32>} : memref<8x1xf32, #tpu.memory_space<vmem>>, vector<8x1xf32>,
    } else {
    }
    %c0 = arith.constant 0 : index
    %c0_1 = arith.constant 0 : index
    %3 = vector.load %arg1[%c0, %c0_1] : memref<8x36xbf16, #tpu.memory_space<vmem>>, vector<8x36xbf16>
    %c0_2 = arith.constant 0 : index
    %c0_3 = arith.constant 0 : index
    %4 = vector.load %arg2[%c0_2, %c0_3] : memref<36x256xbf16, #tpu.memory_space<vmem>>, vector<36x256xbf16>
    %cst = arith.constant dense<0.000000e+00> : vector<8x256xf32>
    %5 = tpu.matmul %3, %4, %cst {dimension_numbers = #tpu.dot_dimension_numbers<[1], [0], [0], [1], [0, 0, 1, 1], [], []>} : vector<8x36xbf16>, vector<36x256xbf16>, vector<8x256xf32> -> vector<8x256xf32>
    %c0_4 = arith.constant 0 : index
    %c0_5 = arith.constant 0 : index
    %6 = vector.load %arg3[%c0_4, %c0_5] : memref<8x256xf32, #tpu.memory_space<vmem>>, vector<8x256xf32>
    tpu.vector_store %arg3[%c0_4, %c0_5], %5 {strides = array<i32>} : memref<8x256xf32, #tpu.memory_space<vmem>>, vector<8x256xf32>,
    %c0_6 = arith.constant 0 : index
    %c0_7 = arith.constant 0 : index
    %7 = vector.load %arg4[%c0_6, %c0_7] : memref<8x1xf32, #tpu.memory_space<vmem>>, vector<8x1xf32>
    %cst_8 = arith.constant dense<0.000000e+00> : vector<8xf32>
    %8 = vector.multi_reduction <add>, %5, %cst_8 [1] : vector<8x256xf32> to vector<8xf32>
    %9 = vector.shape_cast %8 : vector<8xf32> to vector<8x1xf32>
    %10 = arith.addf %7, %9 : vector<8x1xf32>
    %c0_9 = arith.constant 0 : index
    %c0_10 = arith.constant 0 : index
    %11 = vector.load %arg4[%c0_9, %c0_10] : memref<8x1xf32, #tpu.memory_space<vmem>>, vector<8x1xf32>
    tpu.vector_store %arg4[%c0_9, %c0_10], %10 {strides = array<i32>} : memref<8x1xf32, #tpu.memory_space<vmem>>, vector<8x1xf32>,
    %c0_11 = arith.constant 0 : index
    %c0_12 = arith.constant 0 : index
    %12 = vector.load %arg5[%c0_11, %c0_12] : memref<8x1xf32, #tpu.memory_space<vmem>>, vector<8x1xf32>
    %13 = arith.mulf %5, %5 : vector<8x256xf32>
    %cst_13 = arith.constant dense<0.000000e+00> : vector<8xf32>
    %14 = vector.multi_reduction <add>, %13, %cst_13 [1] : vector<8x256xf32> to vector<8xf32>
    %15 = vector.shape_cast %14 : vector<8xf32> to vector<8x1xf32>
    %16 = arith.addf %12, %15 : vector<8x1xf32>
    %c0_14 = arith.constant 0 : index
    %c0_15 = arith.constant 0 : index
    %17 = vector.load %arg5[%c0_14, %c0_15] : memref<8x1xf32, #tpu.memory_space<vmem>>, vector<8x1xf32>
    tpu.vector_store %arg5[%c0_14, %c0_15], %16 {strides = array<i32>} : memref<8x1xf32, #tpu.memory_space<vmem>>, vector<8x1xf32>,
    return
  }
  func.func @transform_0(%arg0: i32) -> (i32, i32) {
    %c0_i32 = arith.constant 0 : i32
    %c0_i32_0 = arith.constant 0 : i32
    %c0_i32_1 = arith.constant 0 : i32
    return %c0_i32, %c0_i32_0 : i32, i32
  }
  func.func @transform_1(%arg0: i32) -> (i32, i32) {
    %c0_i32 = arith.constant 0 : i32
    %c0_i32_0 = arith.constant 0 : i32
    return %c0_i32, %arg0 : i32, i32
  }
  func.func @transform_2(%arg0: i32) -> (i32, i32) {
    %c0_i32 = arith.constant 0 : i32
    %c0_i32_0 = arith.constant 0 : i32
    return %c0_i32, %arg0 : i32, i32
  }
  func.func @transform_3(%arg0: i32) -> (i32, i32) {
    %c0_i32 = arith.constant 0 : i32
    %c0_i32_0 = arith.constant 0 : i32
    %c0_i32_1 = arith.constant 0 : i32
    return %c0_i32, %c0_i32_0 : i32, i32
  }
  func.func @transform_4(%arg0: i32) -> (i32, i32) {
    %c0_i32 = arith.constant 0 : i32
    %c0_i32_0 = arith.constant 0 : i32
    %c0_i32_1 = arith.constant 0 : i32
    return %c0_i32, %c0_i32_0 : i32, i32
  }
}

</mosaic_0001>

<bundles_post_ra>
// kernel: _conv_block_forward.3
= control target key start
LH: loop header
LB: loop body
LE: loop exit
PB: predicated region body
PF: predicated region fallthrough
CT: control target
= control target key end

     0   :  { %s271_s9 = smov 0   ;;  %s291_s0 = inlined_call_operand.vmem [shape: f32[8,2], index: 0, kind: input, shape index: {}]   ;;  %s292_s1 = inlined_call_operand.vmem [shape: f32[8,512], index: 1, kind: input, shape index: {}]   ;;  %s293_s2 = inlined_call_operand.vmem [shape: f32[8,512], index: 2, kind: output, shape index: {}]  }
   0x1 LB: > { %s223_s10 = sadd.s32 4294967295, %s252_s9   ;;  %p227_p0 = scmp.ge.s32.totalorder %s252_s9, 1  ;;  %s252_s9 = sphi %s271_s9, %s12_s9  }
   0x2   : > { %p113_p1 = scmp.lt.s32.totalorder %s252_s9, 3 }
   0x4   : > { %p114_p2 = pnand %p227_p0, %p113_p1 }
   0x5   : > { %v147_v0 = vld [vmem:[%s291_s0] sm:$0xff] (!%p114_p2)  ;;  %v254_v1 = vmov (!%p114_p2), 0   ;;  %v255_v2 = vmov (!%p114_p2), 1   ;;  %s228_s13 = sshll.u32 (!%p114_p2), %s223_s10, 1 }
   0x6   : > { %117 = sbr.rel (%p114_p2) target bundleno = 145 (0x91), region = 28  ;;  %244 = vset.pattern.permute.xlu0 (!%p114_p2), %v254_v1  ;;  %p136_p3 = scmp.lt.s32.totalorder (!%p114_p2), %s228_s13, 3 }
   0x7   : > { %152 = vperm.xlu0 (!%p114_p2), %244, %v147_v0  }
   0xb   : > { %245 = vset.pattern.permute.xlu0 (!%p114_p2), %v255_v2 }
   0xc   : > { %158 = vperm.xlu0 (!%p114_p2), %245, %v147_v0  }
   0xd   : > { %s295_s13 = smov (!%p136_p3, %s228_s13), 3 }
   0xe   : > { %s229_s14 = sshll.u32 %s295_s13, 3 }
   0xf   : > { %s139_s17 = scalar_lea.vmem %s292_s1, %s229_s14  ;;  %s145_s20 = scalar_lea.vmem %s293_s2, %s229_s14 }
  0x10   : > { %v148_v4 = vld [vmem:[%s139_s17] sm:$0xff]  ;;  %v149_v5 = vld [vmem:[%s139_s17 + $0x8] sm:$0xff] }
  0x86   : > { %v153_v3 = vpop.permute.xlu0 %152 }
  0x87   : > { %v155_v6 = vmul.f32 %v153_v3, %v148_v4  ;;  %v156_v7 = vmul.f32 %v153_v3, %v149_v5 }
  0x8b   : > { %v159_v8 = vpop.permute.xlu0 %158 }
  0x8c   : > { %v161_v9 = vadd.f32 %v159_v8, %v155_v6  ;;  %v162_v10 = vadd.f32 %v159_v8, %v156_v7 }
  0x8e   : > { %v163_v11 = vmax.f32 %v161_v9, 0.0  ;;  %v164_v12 = vmax.f32 %v162_v10, 0.0 }
  0x90   : > { %165 = vst [vmem:[%s145_s20] sm:$0xff] %v163_v11  ;;  %166 = vst [vmem:[%s145_s20 + $0x8] sm:$0xff] %v164_v12 }
  0x91 PF: > { %s12_s9 = sadd.s32 1, %s252_s9  }
  0x92   : > { %p9_p4 = scmp.ge.s32.totalorder %s12_s9, 4  }
  0x94   :  { %11 = sbr.rel (!%p9_p4) target bundleno = 1 (0x1), region = 58 }

// kernel: _conv_block_forward.2
= control target key start
LH: loop header
LB: loop body
LE: loop exit
PB: predicated region body
PF: predicated region fallthrough
CT: control target
= control target key end

     0   :  { %s536_s15 = smov 0   ;;  %s538_s16 = smov 0   ;;  %s615_s0 = inlined_call_operand.vmem [shape: bf16[8,36], index: 0, kind: input, shape index: {}]   ;;  %s616_s1 = inlined_call_operand.vmem [shape: bf16[36,512], index: 1, kind: input, shape index: {}]   ;;  %s617_s2 = inlined_call_operand.vmem [shape: f32[8,512], index: 2, kind: output, shape index: {0}]   ;;  %s618_s3 = inlined_call_operand.vmem [shape: f32[8,1], index: 3, kind: output, shape index: {1}]   ;;  %s619_s4 = inlined_call_operand.vmem [shape: f32[8,1], index: 4, kind: output, shape index: {2}]  }
   0x1   :  { %s540_s17 = smov 0  }
   0x2 LB: > { %s428_s18 = sadd.s32 4294967295, %s507_s17   ;;  %s553_s19 = sadd.s32 1, %s507_s17   ;;  %s507_s17 = sphi %s540_s17, %s622_s17   ;;  %s503_s16 = sphi %s538_s16, %s621_s16   ;;  %s499_s15 = sphi %s536_s15, %s620_s15  }
   0x3   : > { %s40_s20 = ssub.s32 %s507_s17, %s553_s19  ;;  %s43_s21 = sadd.s32 1, %s503_s16 }
   0x4   : > { %p41_p0 = scmp.eq.s32.totalorder %s40_s20, 0  ;;  %p50_p1 = scmp.ne.s32.totalorder %s503_s16, %s499_s15 }
   0x5   : > { %p51_p2 = scmp.eq.s32.totalorder %s507_s17, 0  ;;  %p431_p4 = scmp.ge.s32.totalorder %s507_s17, 2 }
   0x6   : > { %s562_s22 = scalar_select %p41_p0, %s503_s16, %s43_s21  }
   0x7   : > { %p52_p3 = por %p51_p2, %p50_p1  ;;  %147 = sbr.rel (%p431_p4) target bundleno = 21 (0x15), region = 20 }
   0xe   : > { %150 = sbr.rel (!%p52_p3) target bundleno = 21 (0x15), region = 24  ;;  %s152_s23 = sand.u32 (%p52_p3), 1, %s503_s16  }
   0xf   : > { %s448_s24 = sshll.u32 (%p52_p3), %s507_s17, 3  ;;  %s449_s25 = smul.u32 (%p52_p3), 40, %s152_s23 }
  0x10   : > { %s157_s28 = scalar_lea.vmem (%p52_p3), %s616_s1, %s448_s24 }
  0x11   : > { %v193_v0 = vld [vmem:[%s157_s28] sm:$0xff] (%p52_p3)  ;;  %v195_v1 = vld [vmem:[%s157_s28 + $0x10] sm:$0xff] (%p52_p3)  ;;  %s154_s29 = scalar_lea.vmem (%p52_p3), [#allocation2], %s449_s25 }
  0x12   : > { %v197_v2 = vld [vmem:[%s157_s28 + $0x20] sm:$0xff] (%p52_p3)  ;;  %v199_v3 = vld [vmem:[%s157_s28 + $0x30] sm:$0xff] (%p52_p3)  ;;  %194 = vst [vmem:[%s154_s29] sm:$0xff] (%p52_p3), %v193_v0  ;;  %196 = vst [vmem:[%s154_s29 + $0x8] sm:$0xff] (%p52_p3), %v195_v1 }
  0x13   : > { %v201_v4 = vld [vmem:[%s157_s28 + $0x40] sm:$0xff] (%p52_p3)  ;;  %198 = vst [vmem:[%s154_s29 + $0x10] sm:$0xff] (%p52_p3), %v197_v2  ;;  %200 = vst [vmem:[%s154_s29 + $0x18] sm:$0xff] (%p52_p3), %v199_v3 }
  0x14   : > { %202 = vst [vmem:[%s154_s29 + $0x20] sm:$0xff] (%p52_p3), %v201_v4 }
  0x15 PF: > { %p434_p5 = scmp.ge.s32.totalorder %s507_s17, 1  ;;  %p207_p6 = scmp.lt.s32.totalorder %s507_s17, 3 }
  0x17   : > { %p208_p7 = pnand %p434_p5, %p207_p6 }
  0x18   : > { %s214_s30 = sand.u32 (!%p208_p7), 1, %s499_s15   ;;  %s435_s5 = sshll.u32 (!%p208_p7), %s428_s18, 1 }
  0x19   : > { %211 = sbr.rel (%p208_p7) target bundleno = 416 (0x1a0), region = 62  ;;  %p241_p8 = scmp.lt.s32.totalorder (!%p208_p7), %s435_s5, 3 }
  0x1a   : > { %s450_s6 = smul.u32 (!%p208_p7), 40, %s214_s30  ;;  %p437_p9 = scmp.ne.s32.totalorder (!%p208_p7), %s428_s18, 0 }
  0x1c   : > { %s216_s11 = scalar_lea.vmem (!%p208_p7), [#allocation2], %s450_s6 }
  0x20   : > { %s624_s5 = smov (!%p241_p8, %s435_s5), 3  ;;  %250 = sbr.rel (%p437_p9) target bundleno = 39 (0x27), region = 70 }
  0x21   : > { %s436_s7 = sshll.u32 %s624_s5, 3  ;;  %vm251_vm0 = vcmask (!%p437_p9), 7168   ;;  %v509_v5 = vmov (!%p437_p9), 0.0  }
  0x22   : > { %s578_s10 = scalar_lea.vmem %s617_s2, %s436_s7  ;;  %252 = vst.msk [vmem:[%s618_s3] sm:$0xff] (!%p437_p9), %vm251_vm0, %v509_v5  ;;  %253 = vst.msk [vmem:[%s619_s4] sm:$0xff] (!%p437_p9), %vm251_vm0, %v509_v5 }
  0x27 PF: > { %v477_v6 = vld [vmem:[%s216_s11 + $0x4] ss:$8 sps:$4 sm:$0xff]   ;;  %v479_v7 = vld [vmem:[%s216_s11] ss:$8 sps:$4 sm:$0xff]   ;;  %v510_v8 = vmov 0   ;;  %vm289_vm1 = vcmask 1041408  }
  0x28   : > { %328 = vmatprep.mubr.bf16.mxu0 %v510_v8  ;;  %296 = vmatprep.subr.bf16.mxu0 %v477_v6  ;;  %v480_v9 = vld [vmem:[%s216_s11 + $0x14] ss:$8 sps:$4 sm:$0xff]   ;;  %v259_v10 = vld [vmem:[%s216_s11 + $0x20] sm:$0x33]  ;;  %v482_v11 = vld [vmem:[%s216_s11 + $0x10] ss:$8 sps:$4 sm:$0xff]  }
  0x29   : > { %297 = vmatpush1.bf16.msra.mxu0 %v479_v7  ;;  %v443_v12 = vcombine.high %v259_v10, %v259_v10  ;;  %v442_v13 = vcombine.low %v259_v10, %v259_v10  ;;  %v254_v15 = vld [vmem:[%s615_s0] sm:$0xf]  ;;  %vm285_vm2 = vcmask 293888   ;;  %vm344_vm3 = vcmask 7168  }
  0x2a   : > { %298 = vmatprep.subr.bf16.mxu0 %v480_v9  ;;  %v339_v24 = vld [vmem:[%s618_s3] sm:$0xff] }
  0x2b   : > { %v291_v14 = vsel %vm289_vm1, %v442_v13, 0  ;;  %v346_v27 = vld [vmem:[%s619_s4] sm:$0xff] }
  0x2d   : > { %299 = vmatpush1.bf16.msra.mxu0 %v482_v11 }
  0x2e   : > { %444 = vmatprep.subr.msk.bf16.mxu0 %vm289_vm1, %v443_v12 }
  0x31   : > { %301 = vmatpush1.bf16.msra.mxu0 %v291_v14 }
  0x34   : > { %445 = vmatmul.mubr.msk.bf16.vlgmr.msra.gmra.mrb[0].mxu0 %vm285_vm2, %v254_v15 }
 0x107   : > { %v330_v16 = vpop.f32.mrb[0].mxu0 }
 0x108   : > { %337 = vst [vmem:[%s578_s10] sm:$0xff] %v330_v16  ;;  %v332_v17 = vpop.f32.mrb[1].mxu0  ;;  %v347_v18 = vmul.f32 %v330_v16, %v330_v16 }
 0x109   : > { %338 = vst [vmem:[%s578_s10 + $0x8] sm:$0xff] %v332_v17  ;;  %v334_v19 = vpop.f32.mrb[2].mxu0  ;;  %v340_v20 = vadd.f32 %v332_v17, %v330_v16  ;;  %v348_v21 = vmul.f32 %v332_v17, %v332_v17 }
 0x10a   : > { %v335_v22 = vpop.f32.mrb[3].mxu0 }
 0x10b   : > { %341 = vadd.xlane.f32.xlu0 %v340_v20  ;;  %v349_v23 = vadd.f32 %v348_v21, %v347_v18 }
 0x10f   : > { %350 = vadd.xlane.f32.xlu0 %v349_v23 }
 0x198   : > { %v342_v25 = vpop.xlane.xlu0 %341 }
 0x199   : > { %v343_v26 = vadd.f32 %v342_v25, %v339_v24 }
 0x19b   : > { %345 = vst.msk [vmem:[%s618_s3] sm:$0xff] %vm344_vm3, %v343_v26 }
 0x19c   : > { %v351_v28 = vpop.xlane.xlu0 %350 }
 0x19d   : > { %v352_v29 = vadd.f32 %v351_v28, %v346_v27 }
 0x19f   : > { %353 = vst.msk [vmem:[%s619_s4] sm:$0xff] %vm344_vm3, %v352_v29 }
 0x1a0 PF: > { %p12_p10 = scmp.ge.s32.totalorder %s553_s19, 4   ;;  %s620_s15 = smov %s503_s16 }
 0x1a1   : > { %s621_s16 = smov %s562_s22  ;;  %s622_s17 = smov %s553_s19 }
 0x1a2   :  { %14 = sbr.rel (!%p12_p10) target bundleno = 2 (0x2), region = 121 }

</bundles_post_ra>
